<compile_context>
chip_gen: v7x
topology: tpu7x:2x2x1
jax: 0.10.0
libtpu: 0.0.40
codegen_flags: <defaults>
</compile_context>

<pallas_src>
import math

import jax
import jax.numpy as jnp
from jax.experimental import pallas as pl
from jax.experimental.pallas import tpu as pltpu


def _linear_attn_kernel(q_ref, k_ref, v_ref, o_ref):
    # q_ref/k_ref: [T, S, D]; v_ref/o_ref: [T, S, Dv]
    T, S, Dv = v_ref.shape

    phi_q = jnp.maximum(q_ref[...], 0.0).astype(jnp.float32)   # ReLU (VPU)
    phi_k = jnp.maximum(k_ref[...], 0.0).astype(jnp.float32)

    # v_aug = [v | 1] built in registers; the ones column folds the
    # normalizer into the same matmul chain as the output.
    v_aug = jnp.concatenate(
        [v_ref[...].astype(jnp.float32), jnp.ones((T, S, 1), jnp.float32)],
        axis=-1)

    # kv_aug[t] = phi_k[t]^T @ v_aug[t]  -> [T, D, Dv+1]
    # Contraction over seq expressed directly (no explicit transpose -> no
    # XLU vxpose / materialized temp before the MXU push).
    kv_aug = jax.lax.dot_general(
        phi_k, v_aug,
        dimension_numbers=(((1,), (1,)), ((0,), (0,))),
        preferred_element_type=jnp.float32)

    # out_aug[t] = phi_q[t] @ kv_aug[t]  -> [T, S, Dv+1]
    out_aug = jax.lax.dot_general(
        phi_q, kv_aug,
        dimension_numbers=(((2,), (1,)), ((0,), (0,))),
        preferred_element_type=jnp.float32)

    # Slice the register value directly (no VMEM round-trip).
    out = out_aug[..., :Dv]
    norm = jnp.maximum(out_aug[..., Dv:], 1e-6)      # clamp BEFORE reciprocal

    # EUP approximate reciprocal + one Newton step (keeps f32-division
    # accuracy), then S*Dv cheap broadcast multiplies instead of divides.
    inv = pl.reciprocal(norm, approx=True)
    inv = inv * (2.0 - norm * inv)

    o_ref[...] = (out * inv).astype(o_ref.dtype)


def _pad2(rows, cols, itemsize=4, sublane=8, lane=128):
    """VMEM bytes for a 2-D f32 tile after (8,128) layout padding."""
    r = -(-rows // sublane) * sublane
    c = -(-cols // lane) * lane
    return r * c * itemsize


def _slab_vmem_bytes(s, d, dv):
    """Padding-aware VMEM bytes for ONE (batch*head) slab in this kernel."""
    # Pipeline-managed I/O is double-buffered: q, k (S,D) and v, o (S,Dv).
    io = 2 * (2 * _pad2(s, d) + 2 * _pad2(s, dv))
    # Kernel-internal temporaries (single-buffered): phi_q, phi_k, v_aug,
    # kv_aug, out_aug.
    tmp = 2 * _pad2(s, d) + _pad2(s, dv + 1) + _pad2(d, dv + 1) + _pad2(s, dv + 1)
    return io + tmp


def _tpu_vmem_capacity_and_multicore():
    """(vmem bytes, is_multi_tensorcore).  Conservative fallbacks if unknown."""
    vmem_cap = 64 * 1024 * 1024          # v7x-safe fallback
    try:
        vmem_cap = int(pltpu.get_tpu_info().vmem_capacity_bytes)
    except Exception:
        pass
    multi_tc = False
    try:
        kind = jax.devices()[0].device_kind.lower()
        multi_tc = ("v7" in kind) or ("7x" in kind)
    except Exception:
        pass
    return vmem_cap, multi_tc


def _choose_bh_tile(bh, s, d, dv, vmem_budget_bytes, multi_tc):
    """Largest divisor of bh whose padded VMEM footprint fits the budget.

    On multi-TensorCore chips (v7x) prefer an EVEN number (>=2) of grid steps
    so both cores get equal slab counts; on single-TC chips take the max tile
    (fewest pipeline steps).
    """
    per_slab = _slab_vmem_bytes(s, d, dv)
    max_tile = max(1, vmem_budget_bytes // per_slab)
    divisors = [t for t in range(1, bh + 1) if bh % t == 0 and t <= max_tile]
    if not divisors:
        divisors = [1]
    tile = max(divisors)
    if multi_tc and bh >= 2:
        even = [t for t in divisors if (bh // t) >= 2 and (bh // t) % 2 == 0]
        if even:
            tile = max(even)
        else:
            multi = [t for t in divisors if (bh // t) >= 2]
            if multi:
                tile = max(multi)
    return tile, per_slab


def linear_attention(query, key, value):
    """query/key: [..., S, D]; value: [..., S, Dv]. Returns [..., S, Dv]."""
    *lead, S, D = query.shape
    Dv = value.shape[-1]
    bh = math.prod(lead) if lead else 1

    q = query.reshape(bh, S, D)
    k = key.reshape(bh, S, D)
    v = value.reshape(bh, S, Dv)

    vmem_cap, multi_tc = _tpu_vmem_capacity_and_multicore()
    vmem_budget = int(vmem_cap * 0.5)      # leave headroom for the compiler
    bh_tile, per_slab = _choose_bh_tile(bh, S, D, Dv, vmem_budget, multi_tc)
    num_tiles = bh // bh_tile              # exact: bh_tile divides bh

    # Derive the scoped-VMEM limit from the real (padded) footprint, capped
    # below physical capacity.  No jnp.pad of q/k/v is ever needed.
    footprint = bh_tile * per_slab
    vmem_limit = int(min(max(2 * footprint, 8 * 1024 * 1024),
                         max(vmem_cap - 8 * 1024 * 1024, 8 * 1024 * 1024)))

    out = pl.pallas_call(
        _linear_attn_kernel,
        out_shape=jax.ShapeDtypeStruct((bh, S, Dv), query.dtype),
        grid_spec=pltpu.PrefetchScalarGridSpec(
            num_scalar_prefetch=0,
            grid=(num_tiles,),
            in_specs=[
                pl.BlockSpec((bh_tile, S, D), lambda i: (i, 0, 0)),
                pl.BlockSpec((bh_tile, S, D), lambda i: (i, 0, 0)),
                pl.BlockSpec((bh_tile, S, Dv), lambda i: (i, 0, 0)),
            ],
            out_specs=pl.BlockSpec((bh_tile, S, Dv), lambda i: (i, 0, 0)),
        ),
        compiler_params=pltpu.CompilerParams(
            dimension_semantics=("parallel",),
            vmem_limit_bytes=vmem_limit,
        ),
    )(q, k, v)

    return out.reshape(*lead, S, Dv)


def _reference(query, key, value):
    phi_q = jnp.maximum(query, 0.0)
    phi_k = jnp.maximum(key, 0.0)
    kv = jnp.matmul(jnp.swapaxes(phi_k, -2, -1), value)
    out = jnp.matmul(phi_q, kv)
    norm = jnp.matmul(
        phi_q, jnp.swapaxes(jnp.sum(phi_k, axis=-2, keepdims=True), -2, -1))
    norm = jnp.maximum(norm, 1e-6)
    return out / norm


if __name__ == "__main__":
    # Module hyper-params (deterministic, synthetic): embed_dim=32, n_heads=2
    embed_dim, n_heads = 32, 2
    head_dim = embed_dim // n_heads          # 16
    B, S = 2, 8

    key0 = jax.random.PRNGKey(0)
    kq, kk, kv_ = jax.random.split(key0, 3)
    query = jax.random.normal(kq, (B, n_heads, S, head_dim), dtype=jnp.float32)
    keyt = jax.random.normal(kk, (B, n_heads, S, head_dim), dtype=jnp.float32)
    value = jax.random.normal(kv_, (B, n_heads, S, head_dim), dtype=jnp.float32)

    out = linear_attention(query, keyt, value)
    out = jax.block_until_ready(out)

    ref = _reference(query, keyt, value)
    assert out.shape == ref.shape
    # Newton-refined approximate reciprocal keeps the result within f32
    # round-off of exact division.
    assert jnp.allclose(out, ref, atol=1e-4, rtol=1e-4), "mismatch vs reference"

    print("KERNEL_OK")
</pallas_src>

<mosaic_0001>
module attributes {stable_mosaic.version = 11 : i64} {
  func.func @_linear_attn_kernel(%arg0: i32, %arg1: memref<4x8x16xf32, #tpu.memory_space<vmem>>, %arg2: memref<4x8x16xf32, #tpu.memory_space<vmem>>, %arg3: memref<4x8x16xf32, #tpu.memory_space<vmem>>, %arg4: memref<4x8x16xf32, #tpu.memory_space<vmem>>) attributes {dimension_semantics = [#tpu.dimension_semantics<parallel>], iteration_bounds = array<i64: 1>, scalar_prefetch = 0 : i64, scratch_operands = 0 : i64, tpu.core_type = #tpu.core_type<tc>, window_params = [{transform_indices = @transform_0, window_bounds = array<i64: 4, 8, 16>}, {transform_indices = @transform_1, window_bounds = array<i64: 4, 8, 16>}, {transform_indices = @transform_2, window_bounds = array<i64: 4, 8, 16>}, {transform_indices = @transform_3, window_bounds = array<i64: 4, 8, 16>}]} {
    %c0 = arith.constant 0 : index
    %c0_0 = arith.constant 0 : index
    %c0_1 = arith.constant 0 : index
    %0 = vector.load %arg1[%c0, %c0_0, %c0_1] : memref<4x8x16xf32, #tpu.memory_space<vmem>>, vector<4x8x16xf32>
    %cst = arith.constant 0.000000e+00 : f32
    %1 = vector.broadcast %cst : f32 to vector<4x8x16xf32>
    %2 = arith.maximumf %0, %1 : vector<4x8x16xf32>
    %c0_2 = arith.constant 0 : index
    %c0_3 = arith.constant 0 : index
    %c0_4 = arith.constant 0 : index
    %3 = vector.load %arg2[%c0_2, %c0_3, %c0_4] : memref<4x8x16xf32, #tpu.memory_space<vmem>>, vector<4x8x16xf32>
    %cst_5 = arith.constant 0.000000e+00 : f32
    %4 = vector.broadcast %cst_5 : f32 to vector<4x8x16xf32>
    %5 = arith.maximumf %3, %4 : vector<4x8x16xf32>
    %c0_6 = arith.constant 0 : index
    %c0_7 = arith.constant 0 : index
    %c0_8 = arith.constant 0 : index
    %6 = vector.load %arg3[%c0_6, %c0_7, %c0_8] : memref<4x8x16xf32, #tpu.memory_space<vmem>>, vector<4x8x16xf32>
    %cst_9 = arith.constant 1.000000e+00 : f32
    %7 = vector.broadcast %cst_9 : f32 to vector<4x8x1xf32>
    %8 = tpu.concatenate %6, %7 in 2 : vector<4x8x16xf32>, vector<4x8x1xf32> -> vector<4x8x17xf32>
    %cst_10 = arith.constant dense<0.000000e+00> : vector<4x16x17xf32>
    %9 = tpu.matmul %5, %8, %cst_10 {dimension_numbers = #tpu.dot_dimension_numbers<[1], [1], [2], [2], [0, 0, 0, 2, 1, 2], [0], [0]>} : vector<4x8x16xf32>, vector<4x8x17xf32>, vector<4x16x17xf32> -> vector<4x16x17xf32>
    %cst_11 = arith.constant dense<0.000000e+00> : vector<4x8x17xf32>
    %10 = tpu.matmul %2, %9, %cst_11 {dimension_numbers = #tpu.dot_dimension_numbers<[2], [1], [1], [2], [0, 0, 0, 1, 1, 2], [0], [0]>} : vector<4x8x16xf32>, vector<4x16x17xf32>, vector<4x8x17xf32> -> vector<4x8x17xf32>
    %11 = vector.extract_strided_slice %10 {offsets = [0, 0, 0], sizes = [4, 8, 16], strides = [1, 1, 1]} : vector<4x8x17xf32> to vector<4x8x16xf32>
    %12 = vector.extract_strided_slice %10 {offsets = [0, 0, 16], sizes = [4, 8, 1], strides = [1, 1, 1]} : vector<4x8x17xf32> to vector<4x8x1xf32>
    %cst_12 = arith.constant 9.99999997E-7 : f32
    %13 = vector.broadcast %cst_12 : f32 to vector<4x8x1xf32>
    %14 = arith.maximumf %12, %13 : vector<4x8x1xf32>
    %15 = tpu.reciprocal %14 {approx = true} : vector<4x8x1xf32> -> vector<4x8x1xf32>
    %16 = arith.mulf %14, %15 : vector<4x8x1xf32>
    %cst_13 = arith.constant 2.000000e+00 : f32
    %17 = vector.broadcast %cst_13 : f32 to vector<4x8x1xf32>
    %18 = arith.subf %17, %16 : vector<4x8x1xf32>
    %19 = arith.mulf %15, %18 : vector<4x8x1xf32>
    %20 = vector.broadcast %19 : vector<4x8x1xf32> to vector<4x8x16xf32>
    %21 = arith.mulf %11, %20 : vector<4x8x16xf32>
    %c0_14 = arith.constant 0 : index
    %c0_15 = arith.constant 0 : index
    %c0_16 = arith.constant 0 : index
    %22 = vector.load %arg4[%c0_14, %c0_15, %c0_16] : memref<4x8x16xf32, #tpu.memory_space<vmem>>, vector<4x8x16xf32>
    tpu.vector_store %arg4[%c0_14, %c0_15, %c0_16], %21 {strides = array<i32>} : memref<4x8x16xf32, #tpu.memory_space<vmem>>, vector<4x8x16xf32>,
    return
  }
  func.func @transform_0(%arg0: i32) -> (i32, i32, i32) {
    %c0_i32 = arith.constant 0 : i32
    %c0_i32_0 = arith.constant 0 : i32
    %c0_i32_1 = arith.constant 0 : i32
    return %arg0, %c0_i32, %c0_i32_0 : i32, i32, i32
  }
  func.func @transform_1(%arg0: i32) -> (i32, i32, i32) {
    %c0_i32 = arith.constant 0 : i32
    %c0_i32_0 = arith.constant 0 : i32
    %c0_i32_1 = arith.constant 0 : i32
    return %arg0, %c0_i32, %c0_i32_0 : i32, i32, i32
  }
  func.func @transform_2(%arg0: i32) -> (i32, i32, i32) {
    %c0_i32 = arith.constant 0 : i32
    %c0_i32_0 = arith.constant 0 : i32
    %c0_i32_1 = arith.constant 0 : i32
    return %arg0, %c0_i32, %c0_i32_0 : i32, i32, i32
  }
  func.func @transform_3(%arg0: i32) -> (i32, i32, i32) {
    %c0_i32 = arith.constant 0 : i32
    %c0_i32_0 = arith.constant 0 : i32
    %c0_i32_1 = arith.constant 0 : i32
    return %arg0, %c0_i32, %c0_i32_0 : i32, i32, i32
  }
}

</mosaic_0001>

<bundles_post_ra>
// kernel: tpu_custom_call.1
= control target key start
LH: loop header
LB: loop body
LE: loop exit
PB: predicated region body
PF: predicated region fallthrough
CT: control target
= control target key end

     0   :  { %8 = vsyncpa [#allocation3], 0  ;;  %s1223_s0 = inlined_call_operand.hbm [shape: f32[4,8,16], index: 0, kind: input, shape index: {}]   ;;  %s1224_s1 = inlined_call_operand.hbm [shape: f32[4,8,16], index: 1, kind: input, shape index: {}]   ;;  %s1225_s2 = inlined_call_operand.hbm [shape: f32[4,8,16], index: 2, kind: input, shape index: {}]   ;;  %s1226_s3 = inlined_call_operand.hbm [shape: f32[4,8,16], index: 3, kind: output, shape index: {}]  }
   0x1   :  { %9 = vsyncpa [#allocation6], 0 }
   0x2   :  { %10 = vsyncpa [#allocation4], 0  ;;  %s1102_s12 = smov [#allocation5]   ;;  %s1103_s14 = smov [#allocation2]  }
   0x3   :  { %s28_s13 = sshll.u32 %s1102_s12, 4  ;;  %s16_s15 = sshll.u32 %s1103_s14, 4  ;;  %s29_s13 = int_to_ptr.vmem [resolvable:$true] %s28_s13  ;;  %s1132_s15 = int_to_ptr.vmem [resolvable:$true] %s16_s15 }
   0x4   :  { %s1008_s18 = scalar_lea.hbm %s1224_s1, 512 }
   0x5   :  { %p1009_p0 = scmp.ne.s32.totalorder %s1224_s1, %s1008_s18  ;;  %p1012_p1 = scmp.lt.u32.totalorder %s1008_s18, %s1224_s1 }
   0x7   :  { %p1014_p2 = pnand %p1012_p1, %p1009_p0 }
   0x9   :  { %1017 = shalt.err (!%p1014_p2)
}
   0xa   :  { %s1018_s23 = scalar_lea.vmem %s29_s13, 512  ;;  %p1023_p4 = scmp.lt.s32.totalorder %s29_s13, %s29_s13 }
   0xb   :  { %p1019_p3 = scmp.ne.s32.totalorder %s29_s13, %s1018_s23  ;;  %p1024_p5 = scmp.lt.s32.totalorder %s1018_s23, %s1018_s23 }
   0xd   :  { %p1025_p6 = por %p1024_p5, %p1023_p4 }
   0xf   :  { %p1026_p7 = pnand %p1025_p6, %p1019_p3 }
  0x11   :  { %1029 = shalt.err (!%p1026_p7)
}
  0x12   :  { %s1104_s24 = smov 128   ;;  %s1105_s25 = smov 8  }
  0x13   :  { %34 = dma.hbm_to_vmem [thread:$0]  %s1224_s1, 512, %s29_s13, [#allocation6], %s1104_s24, %s1104_s24, %s1105_s25  }
  0x14   :  { %s1030_s30 = scalar_lea.hbm %s1223_s0, 512 }
  0x15   :  { %p1031_p8 = scmp.ne.s32.totalorder %s1223_s0, %s1030_s30  ;;  %p1034_p9 = scmp.lt.u32.totalorder %s1030_s30, %s1223_s0 }
  0x17   :  { %p1036_p10 = pnand %p1034_p9, %p1031_p8 }
  0x19   :  { %1039 = shalt.err (!%p1036_p10)
}
  0x1a   :  { %s1040_s8 = scalar_lea.vmem %s1132_s15, 512  ;;  %p1045_p12 = scmp.lt.s32.totalorder %s1132_s15, %s1132_s15 }
  0x1b   :  { %p1041_p11 = scmp.ne.s32.totalorder %s1132_s15, %s1040_s8  ;;  %p1046_p13 = scmp.lt.s32.totalorder %s1040_s8, %s1040_s8 }
  0x1d   :  { %p1047_p0 = por %p1046_p13, %p1045_p12 }
  0x1f   :  { %p1048_p1 = pnand %p1047_p0, %p1041_p11 }
  0x21   :  { %1051 = shalt.err (!%p1048_p1)
}
  0x22   :  { %22 = dma.hbm_to_vmem [thread:$0]  %s1223_s0, 512, %s1132_s15, [#allocation3], %s1104_s24, %s1104_s24, %s1105_s25  }
  0x23   :  { %s1106_s10 = smov [#allocation7]   ;;  %s1052_s14 = scalar_lea.hbm %s1225_s2, 512 }
  0x24   :  { %s40_s11 = sshll.u32 %s1106_s10, 4  ;;  %p1053_p2 = scmp.ne.s32.totalorder %s1225_s2, %s1052_s14  ;;  %s41_s11 = int_to_ptr.vmem [resolvable:$true] %s40_s11 }
  0x25   :  { %p1056_p3 = scmp.lt.u32.totalorder %s1052_s14, %s1225_s2 }
  0x27   :  { %p1058_p4 = pnand %p1056_p3, %p1053_p2 }
  0x29   :  { %1061 = shalt.err (!%p1058_p4)
}
  0x2a   :  { %s1062_s20 = scalar_lea.vmem %s41_s11, 512  ;;  %p1067_p6 = scmp.lt.s32.totalorder %s41_s11, %s41_s11 }
  0x2b   :  { %p1063_p5 = scmp.ne.s32.totalorder %s41_s11, %s1062_s20  ;;  %p1068_p7 = scmp.lt.s32.totalorder %s1062_s20, %s1062_s20 }
  0x2d   :  { %p1069_p8 = por %p1068_p7, %p1067_p6 }
  0x2f   :  { %p1070_p9 = pnand %p1069_p8, %p1063_p5 }
  0x31   :  { %1073 = shalt.err (!%p1070_p9)
}
  0x32   :  { %46 = dma.hbm_to_vmem [thread:$0]  %s1225_s2, 512, %s41_s11, [#allocation6], %s1104_s24, %s1104_s24, %s1105_s25  }
  0x33   :  { %1096 = dma.done.wait [#allocation3], 512  }
  0x34   :  { %1097 = vsyncadd [#allocation3], 4294966784 }
  0x35   :  { %1098 = dma.done.wait [#allocation6], 1024  }
  0x36   :  { %1099 = vsyncadd [#allocation6], 4294966272  ;;  %v64_v0 = vld [vmem:[#allocation5] sm:$0xff]  ;;  %v66_v1 = vld [vmem:[#allocation5 + $0x10] sm:$0xff]  ;;  %vm76_vm0 = vcmask 130048   ;;  %vm113_vm1 = vcmask 64512  }
  0x37   :  { %v68_v2 = vmax.f32 %v64_v0, 0.0  ;;  %v70_v3 = vmax.f32 %v66_v1, 0.0  ;;  %v65_v4 = vld [vmem:[#allocation5 + $0x8] sm:$0xff]  ;;  %v67_v5 = vld [vmem:[#allocation5 + $0x18] sm:$0xff]  ;;  %v72_v8 = vld [vmem:[#allocation7] sm:$0xff]  ;;  %v1107_v24 = vmov 0.0|0.0  }
  0x38   :  { %v69_v6 = vmax.f32 %v65_v4, 0.0  ;;  %v71_v7 = vmax.f32 %v67_v5, 0.0  ;;  %v77_v9 = vsel %vm76_vm0, %v72_v8, 1.0  ;;  %v74_v10 = vld [vmem:[#allocation7 + $0x10] sm:$0xff]  ;;  %v73_v12 = vld [vmem:[#allocation7 + $0x8] sm:$0xff]  ;;  %v75_v14 = vld [vmem:[#allocation7 + $0x18] sm:$0xff] }
  0x39   :  { %81 = vxpose.xlu0.b32.start.end [1/1] (short) (narrow) %v68_v2, 16  ;;  %308 = vxpose.xlu1.b32.start.end [1/1] (short) (narrow) %v70_v3, 16  ;;  %v79_v11 = vsel %vm76_vm0, %v74_v10, 1.0  ;;  %v78_v13 = vsel %vm76_vm0, %v73_v12, 1.0  ;;  %v80_v15 = vsel %vm76_vm0, %v75_v14, 1.0  ;;  %vm1108_vm2 = vmmov 0  }
  0x3a   :  { %928 = vmatprep.subr.mxu0 %v77_v9  ;;  %933 = vmatprep.subr.mxu1 %v78_v13  ;;  %v1109_v25 = vmov 0.0   ;;  %v56_v27 = vld [vmem:[#allocation2] sm:$0xff]  ;;  %v58_v32 = vld [vmem:[#allocation2 + $0x10] sm:$0xff]  ;;  %v57_v37 = vld [vmem:[#allocation2 + $0x8] sm:$0xff]  ;;  %v1110_v46 = vmov 16   ;;  %s1111_s2 = smov [#allocation8]  }
  0x3b   :  { %929 = vmatpush3.msra.mxu0 %v77_v9  ;;  %934 = vmatpush3.msra.mxu1 %v78_v13  ;;  %v60_v30 = vmax.f32 %v56_v27, 0.0  ;;  %v62_v35 = vmax.f32 %v58_v32, 0.0  ;;  %v61_v40 = vmax.f32 %v57_v37, 0.0  ;;  %v59_v42 = vld [vmem:[#allocation2 + $0x18] sm:$0xff]  ;;  %s879_s21 = sshll.u32 %s1111_s2, 4  ;;  %s880_s21 = int_to_ptr.vmem [resolvable:$true] %s879_s21 }
  0x3c   :  { %938 = vmatprep.subr.mxu0 %v79_v11  ;;  %943 = vmatprep.subr.mxu1 %v80_v15  ;;  %v63_v45 = vmax.f32 %v59_v42, 0.0  ;;  %s1074_s22 = scalar_lea.vmem %s880_s21, 512  ;;  %p1079_p11 = scmp.lt.s32.totalorder %s880_s21, %s880_s21 }
  0x3d   :  { %p1075_p10 = scmp.ne.s32.totalorder %s880_s21, %s1074_s22  ;;  %p1080_p12 = scmp.lt.s32.totalorder %s1074_s22, %s1074_s22 }
  0x3e   :  { %195 = vxpose.xlu0.b32.start.end [1/1] (short) (narrow) %v69_v6, 16  ;;  %421 = vxpose.xlu1.b32.start.end [1/1] (short) (narrow) %v71_v7, 16 }
  0x3f   :  { %p1081_p13 = por %p1080_p12, %p1079_p11 }
  0x41   :  { %p1082_p0 = pnand %p1081_p13, %p1075_p10 }
  0x5c   :  { %999 = vset.pattern.permute.xlu1 %v1110_v46 }
  0x67   :  { %998 = vset.pattern.permute.xlu0 %v1110_v46 }
  0xb9   :  { %v97_v16 = vpop.trf.xlu0  ;;  %v324_v17 = vpop.trf.xlu1 }
  0xba   :  { %930 = vmatprep.mubr.msk.f32.mxu0 %vm113_vm1, %v97_v16 }
  0xbd   :  { %v98_v18 = vpop.trf.xlu0  ;;  %v325_v19 = vpop.trf.xlu1 }
  0xbe   :  { %931 = vmatmul.mubr.msk.f32.vlgmr.msra.gmra.mrb[0].mxu0 %vm113_vm1, %v98_v18 }
  0xbf   :  { %939 = vmatpush3.msra.mxu0 %v79_v11  ;;  %940 = vmatprep.mubr.msk.f32.mxu0 %vm113_vm1, %v324_v17 }
  0xc0   :  { %976 = vmatprep.subr.bf16.mxu0 %v1107_v24 }
  0xc1   :  { %v211_v20 = vpop.trf.xlu0  ;;  %v437_v21 = vpop.trf.xlu1 }
  0xc2   :  { %935 = vmatprep.mubr.msk.f32.mxu1 %vm113_vm1, %v211_v20  ;;  %941 = vmatmul.mubr.msk.f32.vlgmr.msra.gmra.mrb[2].mxu0 %vm113_vm1, %v325_v19 }
  0xc3   :  { %952 = vmatprep.mubr.msk.f32.mxu0 %vm1108_vm2, %v1109_v25 }
  0xc5   :  { %v212_v22 = vpop.trf.xlu0  ;;  %v438_v23 = vpop.trf.xlu1 }
  0xc6   :  { %936 = vmatmul.mubr.msk.f32.vlgmr.msra.gmra.mrb[0].mxu1 %vm113_vm1, %v212_v22 }
  0xc7   :  { %944 = vmatpush3.msra.mxu1 %v80_v15  ;;  %945 = vmatprep.mubr.msk.f32.mxu1 %vm113_vm1, %v437_v21 }
  0xc8   :  { %979 = vmatprep.subr.bf16.mxu1 %v1107_v24 }
  0xca   :  { %946 = vmatmul.mubr.msk.f32.vlgmr.msra.gmra.mrb[2].mxu1 %vm113_vm1, %v438_v23 }
  0xcb   :  { %959 = vmatprep.mubr.msk.f32.mxu1 %vm1108_vm2, %v1109_v25 }
 0x191   :  { %v932_v26 = vpop.f32.mrb[0].mxu0 }
 0x192   :  { %v186_v28 = vpop.f32.mrb[1].mxu0 }
 0x193   :  { %v977_v29 = vpack.c.bf16 %v932_v26, %v186_v28 }
 0x195   :  { %v942_v31 = vpop.f32.mrb[2].mxu0  ;;  %978 = vmatpush3.bf16.msra.mxu0 %v977_v29 }
 0x196   :  { %v412_v33 = vpop.f32.mrb[3].mxu0  ;;  %982 = vmatprep.subr.bf16.mxu0 %v1107_v24 }
 0x197   :  { %v983_v34 = vpack.c.bf16 %v942_v31, %v412_v33 }
 0x198   :  { %953 = vmatmul.mubr.msk.f32.vlgmr.msra.gmra.mrb[4].mxu0 %vm76_vm0, %v60_v30 }
 0x199   :  { %v937_v36 = vpop.f32.mrb[0].mxu1  ;;  %984 = vmatpush3.bf16.msra.mxu0 %v983_v34  ;;  %966 = vmatprep.mubr.msk.f32.mxu0 %vm1108_vm2, %v1109_v25 }
 0x19a   :  { %v299_v38 = vpop.f32.mrb[1].mxu1 }
 0x19b   :  { %v980_v39 = vpack.c.bf16 %v937_v36, %v299_v38 }
 0x19c   :  { %967 = vmatmul.mubr.msk.f32.vlgmr.msra.gmra.mrb[6].mxu0 %vm76_vm0, %v62_v35 }
 0x19d   :  { %v947_v41 = vpop.f32.mrb[2].mxu1  ;;  %981 = vmatpush3.bf16.msra.mxu1 %v980_v39 }
 0x19e   :  { %v525_v43 = vpop.f32.mrb[3].mxu1  ;;  %985 = vmatprep.subr.bf16.mxu1 %v1107_v24 }
 0x19f   :  { %v986_v44 = vpack.c.bf16 %v947_v41, %v525_v43 }
 0x1a0   :  { %960 = vmatmul.mubr.msk.f32.vlgmr.msra.gmra.mrb[4].mxu1 %vm76_vm0, %v61_v40 }
 0x1a1   :  { %987 = vmatpush3.bf16.msra.mxu1 %v986_v44  ;;  %973 = vmatprep.mubr.msk.f32.mxu1 %vm1108_vm2, %v1109_v25 }
 0x1a4   :  { %974 = vmatmul.mubr.msk.f32.vlgmr.msra.gmra.mrb[6].mxu1 %vm76_vm0, %v63_v45 }
 0x26b   :  { %v603_v47 = vpop.f32.mrb[4].mxu0 }
 0x26c   :  { %v826_v48 = vmax.f32 %v603_v47, 1e-06  ;;  %v954_v49 = vpop.f32.mrb[5].mxu0 }
 0x26e   :  { %1000 = vrcp.f32 %v826_v48 }
 0x26f   :  { %v749_v50 = vpop.f32.mrb[6].mxu0 }
 0x270   :  { %v828_v51 = vmax.f32 %v749_v50, 1e-06  ;;  %v968_v52 = vpop.f32.mrb[7].mxu0 }
 0x272   :  { %1002 = vrcp.f32 %v828_v51 }
 0x273   :  { %v676_v53 = vpop.f32.mrb[4].mxu1 }
 0x274   :  { %v827_v54 = vmax.f32 %v676_v53, 1e-06  ;;  %v961_v55 = vpop.f32.mrb[5].mxu1 }
 0x276   :  { %1004 = vrcp.f32 %v827_v54 }
 0x277   :  { %v822_v56 = vpop.f32.mrb[6].mxu1 }
 0x278   :  { %v1001_v57 = vpop.eup %1000  ;;  %v829_v58 = vmax.f32 %v822_v56, 1e-06  ;;  %v975_v59 = vpop.f32.mrb[7].mxu1 }
 0x279   :  { %v834_v60 = vmul.f32 %v1001_v57, %v826_v48 }
 0x27a   :  { %1006 = vrcp.f32 %v829_v58 }
 0x27b   :  { %v838_v61 = vsub.f32 2.0, %v834_v60 }
 0x27c   :  { %v1003_v63 = vpop.eup %1002 }
 0x27d   :  { %v842_v62 = vmul.f32 %v1001_v57, %v838_v61  ;;  %v836_v1 = vmul.f32 %v1003_v63, %v828_v51 }
 0x27f   :  { %848 = vperm.xlu0 %998, %v842_v62   ;;  %v840_v5 = vsub.f32 2.0, %v836_v1 }
 0x280   :  { %v1005_v0 = vpop.eup %1004 }
 0x281   :  { %v835_v2 = vmul.f32 %v1005_v0, %v827_v54  ;;  %v844_v9 = vmul.f32 %v1003_v63, %v840_v5 }
 0x283   :  { %v839_v3 = vsub.f32 2.0, %v835_v2 }
 0x284   :  { %v1007_v4 = vpop.eup %1006 }
 0x285   :  { %v837_v6 = vmul.f32 %v1007_v4, %v829_v58  ;;  %v843_v7 = vmul.f32 %v1005_v0, %v839_v3 }
 0x287   :  { %853 = vperm.xlu1 %999, %v843_v7   ;;  %v841_v8 = vsub.f32 2.0, %v837_v6 }
 0x289   :  { %v845_v10 = vmul.f32 %v1007_v4, %v841_v8 }
 0x28b   :  { %858 = vperm.xlu1 %999, %v844_v9  }
 0x28f   :  { %863 = vperm.xlu1 %999, %v845_v10  }
 0x2fe   :  { %v849_v11 = vpop.permute.xlu0 %848 }
 0x2ff   :  { %v866_v12 = vmul.f32 %v849_v11, %v603_v47 }
 0x301   :  { %870 = vst.msk [vmem:[#allocation8] sm:$0xff] %vm76_vm0, %v866_v12 }
 0x306   :  { %v854_v13 = vpop.permute.xlu1 %853 }
 0x307   :  { %v867_v14 = vmul.f32 %v854_v13, %v676_v53 }
 0x309   :  { %871 = vst.msk [vmem:[#allocation8 + $0x8] sm:$0xff] %vm76_vm0, %v867_v14 }
 0x30a   :  { %v859_v15 = vpop.permute.xlu1 %858 }
 0x30b   :  { %v868_v16 = vmul.f32 %v859_v15, %v749_v50 }
 0x30d   :  { %872 = vst.msk [vmem:[#allocation8 + $0x10] sm:$0xff] %vm76_vm0, %v868_v16 }
 0x30e   :  { %v864_v17 = vpop.permute.xlu1 %863 }
 0x30f   :  { %v869_v18 = vmul.f32 %v864_v17, %v822_v56 }
 0x311   :  { %873 = vst.msk [vmem:[#allocation8 + $0x18] sm:$0xff] %vm76_vm0, %v869_v18 }
 0x312   :  { %1085 = shalt.err (!%p1082_p0)
}
 0x313   :  { %s1086_s27 = scalar_lea.hbm %s1226_s3, 512 }
 0x314   :  { %p1087_p1 = scmp.ne.s32.totalorder %s1226_s3, %s1086_s27  ;;  %p1090_p2 = scmp.lt.u32.totalorder %s1086_s27, %s1226_s3 }
 0x316   :  { %p1092_p3 = pnand %p1090_p2, %p1087_p1 }
 0x318   :  { %1095 = shalt.err (!%p1092_p3)
}
 0x319   :  { %885 = dma.vmem_to_hbm [thread:$0]  %s880_s21, 512, %s1226_s3, [#allocation4], %s1104_s24, %s1104_s24, %s1105_s25  }
 0x31a   :  { %1100 = dma.done.wait [#allocation4], 512  }
 0x31b   :  { %1101 = vsyncadd [#allocation4], 4294966784 }
 0x31c   :  { %889 = vsyncpa [#allocation3], 1 }
 0x31d   :  { %890 = vsyncpa [#allocation6], 1 }
 0x31e   :  { %891 = vsyncpa [#allocation4], 1 }

</bundles_post_ra>
